<compile_context>
chip_gen: v5e
topology: v5e:2x2
jax: 0.10.0
libtpu: 0.0.40
codegen_flags: <defaults>
</compile_context>

<pallas_src>
import functools

import numpy as np

import jax
import jax.numpy as jnp
from jax.experimental import pallas as pl
from jax.experimental.pallas import tpu as pltpu

_T = 750          # the reference hard-codes `for i in range(750)`
_J = 11           # the reference hard-codes `for j in range(11)`
_LANE = 128
_SUBLANE = 8


def _round_up(x, m):
    return (x + m - 1) // m * m


def _acte_kernel(a_ref, a2_ref, sa4_ref, sa3_ref, r3_ref, a4s3_ref,
                 mb_ref, mj_ref, loss_ref, *,
                 sigma, e_theta, e_alpha, e_g, batch):
    """All inputs are zero-padded and fully VMEM resident.

      a, a2   : (BP, TP)     raw actioness / actioness_2
      sa4,sa3 : (RP, TP)     packed shifted pads: row k = j*B + b -> A4/A3[b, j:j+T]
      r3      : (J, BP, TP)  r3[c, b, :]   = A[(11*b + c) % B, :]
      a4s3    : (J, BP, TP)  a4s3[c, b, :] = A4[b, c:c+T]
      mb      : (RP, BP)     0/1: row k selects batch row k % B   (valid k only)
      mj      : (RP, RP)     0/1: same-shift group membership (k // B == k' // B)
    """
    f32 = jnp.float32
    a = a_ref[...]
    a2 = a2_ref[...]
    sa4 = sa4_ref[...]
    sa3 = sa3_ref[...]
    mb = mb_ref[...]
    mj = mj_ref[...]

    neg_inv_2s2 = -1.0 / (2.0 * sigma * sigma)     # trace-time constants
    inv_b = 1.0 / batch

    # mw[b,i] = max_c ( A[(11b+c)%B, i] - A4[b, i+c] ) — statically unrolled over
    # pre-shifted slabs (static leading-axis indexing only, no lane-offset slices).
    mw = r3_ref[0] - a4s3_ref[0]
    for c in range(1, _J):
        mw = jnp.maximum(mw, r3_ref[c] - a4s3_ref[c])
    g = e_g * mw * mw                                          # (BP, TP)

    # Main term, packed over (j, b) along the sublane axis: each VPU/EUP op runs
    # once on (RP, TP) at ~full occupancy.  The otherwise-idle MXU does the 0/1
    # broadcasts and the batch-L2^2 group reduction (exact for one-hot rows).
    s_a = jnp.dot(mb, a, preferred_element_type=f32)            # A[b,:] per j-row
    s_a2 = jnp.dot(mb, a2, preferred_element_type=f32)          # A2[b,:] per j-row
    diff = s_a - sa4
    d2 = jnp.dot(mj, diff * diff, preferred_element_type=f32)   # sum_b, re-broadcast
    gb = jnp.dot(mb, g, preferred_element_type=f32)             # e_g*mw^2 per j-row
    # relu(d2 - g) + g == max(d2, g)
    w = jnp.exp(jnp.maximum(d2, gb) * neg_inv_2s2)              # EUP exp, full vregs
    absd = jnp.abs(s_a2 - sa3)                                  # exactly 0 in padding
    main = jnp.sum(w * absd) * inv_b

    # e_theta * mean_b ||A[b,:] - A2[b,:]||_2^2   (pad rows/lanes are zero)
    dr = a - a2
    reg = e_theta * jnp.sum(dr * dr) * inv_b

    loss_ref[0, 0] = (main + reg) * e_alpha


def _pad_like_reference(x):
    """Reference-exact padding (B, T) -> (B, T+11): first/last values replicated
    via the reference's repeat(1,6).reshape(B,6) batch interleave, with column
    T+5 ending up holding the true per-row last value (overwritten by the
    `[:, 6:-5] = x` assignment in the reference)."""
    b = x.shape[0]
    first = jnp.tile(x[:, 0], 6).reshape(b, 6)
    last = jnp.tile(x[:, -1], 6).reshape(b, 6)
    return jnp.concatenate([first, x, last[:, 1:]], axis=1)


def acte_loss_v3(actioness, actioness_2, *,
                 sigma=1.0, e_theta=0.1, e_alpha=1.0, e_g=1.0):
    """actioness, actioness_2: (B, 750) float arrays -> scalar f32 loss."""
    a = jnp.asarray(actioness, jnp.float32)
    a2 = jnp.asarray(actioness_2, jnp.float32)
    b, t = a.shape
    if t != _T:
        raise ValueError(f"ActELoss_v3 reference hard-codes T={_T}, got T={t}")

    jb = _J * b
    rp = _round_up(jb, _SUBLANE)     # packed (j, b) rows, sublane aligned
    bp = _round_up(b, _SUBLANE)      # batch rows, sublane aligned
    tp = _round_up(t, _LANE)         # lane-dense time axis

    a4 = _pad_like_reference(a)      # (B, T+11)
    a3 = _pad_like_reference(a2)

    # Shifted windows: win[b, j, i] = arr[b, i + j]   (one gather per array).
    idx = jnp.arange(_J)[:, None] + jnp.arange(t)[None, :]       # (J, T)
    a4w = a4[:, idx]                 # (B, J, T)
    a3w = a3[:, idx]

    def pack(win):                   # (B, J, T) -> (RP, TP), row k = j*B + b
        s = jnp.transpose(win, (1, 0, 2)).reshape(jb, t)
        return jnp.pad(s, ((0, rp - jb), (0, tp - t)))

    sa4 = pack(a4w)
    sa3 = pack(a3w)

    # 3-D slabs for the mw max (same shifted data, (J, BP, TP) layout), plus the
    # reference's repeat(1, 11) batch-interleaved actioness rows.
    a4s3 = jnp.pad(jnp.transpose(a4w, (1, 0, 2)),
                   ((0, 0), (0, bp - b), (0, tp - t)))
    perm = (11 * jnp.arange(b)[None, :] + jnp.arange(_J)[:, None]) % b   # (J, B)
    r3 = jnp.pad(a[perm], ((0, 0), (0, bp - b), (0, tp - t)))

    a_p = jnp.pad(a, ((0, bp - b), (0, tp - t)))
    a2_p = jnp.pad(a2, ((0, bp - b), (0, tp - t)))

    # Trace-time 0/1 matrices driving the MXU broadcasts / group reduction.
    k = np.arange(rp)
    valid = k < jb
    mb = np.zeros((rp, bp), np.float32)
    mb[k[valid], k[valid] % b] = 1.0
    mj = ((k[:, None] // b == k[None, :] // b)
          & valid[:, None] & valid[None, :]).astype(np.float32)

    kernel = functools.partial(_acte_kernel, sigma=float(sigma),
                               e_theta=float(e_theta), e_alpha=float(e_alpha),
                               e_g=float(e_g), batch=b)

    inputs = (a_p, a2_p, sa4, sa3, r3, a4s3, jnp.asarray(mb), jnp.asarray(mj))
    bytes_accessed = int(sum(int(x.size) for x in inputs)) * 4 + 4
    out = pl.pallas_call(
        kernel,
        out_shape=jax.ShapeDtypeStruct((1, 1), jnp.float32),
        # Fixed tiny problem (<1 MB of f32): everything VMEM resident in a single
        # ungridded invocation — no grid / pipelining needed.  (If B ever grows,
        # tile over batch and set pltpu.CompilerParams(vmem_limit_bytes=...).)
        in_specs=[pl.BlockSpec(memory_space=pltpu.MemorySpace.VMEM)] * len(inputs),
        out_specs=pl.BlockSpec(memory_space=pltpu.MemorySpace.SMEM),
        cost_estimate=pl.CostEstimate(flops=30 * b * t * _J,
                                      transcendentals=b * t * _J,
                                      bytes_accessed=bytes_accessed),
    )(*inputs)
    return out[0, 0]


def _acte_loss_reference(a, a2, *, sigma, e_theta, e_alpha, e_g):
    """Independent pure-JAX re-statement of the PyTorch forward (for checking)."""
    b, t = a.shape
    a4 = _pad_like_reference(a)
    a3 = _pad_like_reference(a2)
    a4w = jnp.stack([a4[:, j:j + t] for j in range(_J)], axis=1)   # (B, J, T)
    a3w = jnp.stack([a3[:, j:j + t] for j in range(_J)], axis=1)
    perm = (11 * jnp.arange(b)[:, None] + jnp.arange(_J)[None, :]) % b   # (B, J)
    r = a[perm]                                                    # (B, J, T)
    mw = jnp.max(r - a4w, axis=1)                                  # (B, T)
    g = e_g * mw * mw
    d2 = jnp.sum((a[:, None, :] - a4w) ** 2, axis=0)               # (J, T)
    expo = jnp.maximum(d2[None, :, :] - g[:, None, :], 0.0) + g[:, None, :]
    w = jnp.exp(-expo / 2.0 / sigma / sigma)                       # (B, J, T)
    absd = jnp.abs(a2[:, None, :] - a3w)
    main = jnp.sum(jnp.mean(w * absd, axis=0))
    reg = jnp.mean(e_theta * jnp.sum((a - a2) ** 2, axis=1))
    return (main + reg) * e_alpha


if __name__ == "__main__":
    key = jax.random.PRNGKey(0)
    k1, k2 = jax.random.split(key)
    B, T = 2, _T        # T = 750 is forced by the reference's hard-coded loops
    actioness = jax.nn.sigmoid(jax.random.normal(k1, (B, T), jnp.float32))
    actioness_2 = jax.nn.sigmoid(jax.random.normal(k2, (B, T), jnp.float32))

    cfg = dict(sigma=1.0, e_theta=0.1, e_alpha=1.0, e_g=1.0)
    loss_fn = jax.jit(functools.partial(acte_loss_v3, **cfg))
    loss = loss_fn(actioness, actioness_2)
    jax.block_until_ready(loss)

    ref = jax.jit(functools.partial(_acte_loss_reference, **cfg))(
        actioness, actioness_2)
    jax.block_until_ready(ref)

    assert bool(jnp.isfinite(loss))
    assert bool(jnp.allclose(loss, ref, rtol=1e-3, atol=1e-3)), (loss, ref)
    print("KERNEL_OK")
</pallas_src>

<mosaic_0001>
module attributes {stable_mosaic.version = 11 : i64} {
  func.func @_acte_kernel(%arg0: memref<8x768xf32, #tpu.memory_space<vmem>>, %arg1: memref<8x768xf32, #tpu.memory_space<vmem>>, %arg2: memref<24x768xf32, #tpu.memory_space<vmem>>, %arg3: memref<24x768xf32, #tpu.memory_space<vmem>>, %arg4: memref<11x8x768xf32, #tpu.memory_space<vmem>>, %arg5: memref<11x8x768xf32, #tpu.memory_space<vmem>>, %arg6: memref<24x8xf32, #tpu.memory_space<vmem>>, %arg7: memref<24x24xf32, #tpu.memory_space<vmem>>, %arg8: memref<1x1xf32, #tpu.memory_space<smem>>) attributes {dimension_semantics = [], scalar_prefetch = 0 : i64, scratch_operands = 0 : i64, tpu.core_type = #tpu.core_type<tc>} {
    %c0 = arith.constant 0 : index
    %c0_0 = arith.constant 0 : index
    %0 = vector.load %arg0[%c0, %c0_0] : memref<8x768xf32, #tpu.memory_space<vmem>>, vector<8x768xf32>
    %c0_1 = arith.constant 0 : index
    %c0_2 = arith.constant 0 : index
    %1 = vector.load %arg1[%c0_1, %c0_2] : memref<8x768xf32, #tpu.memory_space<vmem>>, vector<8x768xf32>
    %c0_3 = arith.constant 0 : index
    %c0_4 = arith.constant 0 : index
    %2 = vector.load %arg2[%c0_3, %c0_4] : memref<24x768xf32, #tpu.memory_space<vmem>>, vector<24x768xf32>
    %c0_5 = arith.constant 0 : index
    %c0_6 = arith.constant 0 : index
    %3 = vector.load %arg3[%c0_5, %c0_6] : memref<24x768xf32, #tpu.memory_space<vmem>>, vector<24x768xf32>
    %c0_7 = arith.constant 0 : index
    %c0_8 = arith.constant 0 : index
    %4 = vector.load %arg6[%c0_7, %c0_8] : memref<24x8xf32, #tpu.memory_space<vmem>>, vector<24x8xf32>
    %c0_9 = arith.constant 0 : index
    %c0_10 = arith.constant 0 : index
    %5 = vector.load %arg7[%c0_9, %c0_10] : memref<24x24xf32, #tpu.memory_space<vmem>>, vector<24x24xf32>
    %c0_11 = arith.constant 0 : index
    %c0_12 = arith.constant 0 : index
    %c0_13 = arith.constant 0 : index
    %6 = vector.load %arg4[%c0_11, %c0_12, %c0_13] : memref<11x8x768xf32, #tpu.memory_space<vmem>>, vector<1x8x768xf32>
    %7 = vector.shape_cast %6 : vector<1x8x768xf32> to vector<8x768xf32>
    %c0_14 = arith.constant 0 : index
    %c0_15 = arith.constant 0 : index
    %c0_16 = arith.constant 0 : index
    %8 = vector.load %arg5[%c0_14, %c0_15, %c0_16] : memref<11x8x768xf32, #tpu.memory_space<vmem>>, vector<1x8x768xf32>
    %9 = vector.shape_cast %8 : vector<1x8x768xf32> to vector<8x768xf32>
    %10 = arith.subf %7, %9 : vector<8x768xf32>
    %c1 = arith.constant 1 : index
    %c0_17 = arith.constant 0 : index
    %c0_18 = arith.constant 0 : index
    %11 = vector.load %arg4[%c1, %c0_17, %c0_18] : memref<11x8x768xf32, #tpu.memory_space<vmem>>, vector<1x8x768xf32>
    %12 = vector.shape_cast %11 : vector<1x8x768xf32> to vector<8x768xf32>
    %c1_19 = arith.constant 1 : index
    %c0_20 = arith.constant 0 : index
    %c0_21 = arith.constant 0 : index
    %13 = vector.load %arg5[%c1_19, %c0_20, %c0_21] : memref<11x8x768xf32, #tpu.memory_space<vmem>>, vector<1x8x768xf32>
    %14 = vector.shape_cast %13 : vector<1x8x768xf32> to vector<8x768xf32>
    %15 = arith.subf %12, %14 : vector<8x768xf32>
    %16 = arith.maximumf %10, %15 : vector<8x768xf32>
    %c2 = arith.constant 2 : index
    %c0_22 = arith.constant 0 : index
    %c0_23 = arith.constant 0 : index
    %17 = vector.load %arg4[%c2, %c0_22, %c0_23] : memref<11x8x768xf32, #tpu.memory_space<vmem>>, vector<1x8x768xf32>
    %18 = vector.shape_cast %17 : vector<1x8x768xf32> to vector<8x768xf32>
    %c2_24 = arith.constant 2 : index
    %c0_25 = arith.constant 0 : index
    %c0_26 = arith.constant 0 : index
    %19 = vector.load %arg5[%c2_24, %c0_25, %c0_26] : memref<11x8x768xf32, #tpu.memory_space<vmem>>, vector<1x8x768xf32>
    %20 = vector.shape_cast %19 : vector<1x8x768xf32> to vector<8x768xf32>
    %21 = arith.subf %18, %20 : vector<8x768xf32>
    %22 = arith.maximumf %16, %21 : vector<8x768xf32>
    %c3 = arith.constant 3 : index
    %c0_27 = arith.constant 0 : index
    %c0_28 = arith.constant 0 : index
    %23 = vector.load %arg4[%c3, %c0_27, %c0_28] : memref<11x8x768xf32, #tpu.memory_space<vmem>>, vector<1x8x768xf32>
    %24 = vector.shape_cast %23 : vector<1x8x768xf32> to vector<8x768xf32>
    %c3_29 = arith.constant 3 : index
    %c0_30 = arith.constant 0 : index
    %c0_31 = arith.constant 0 : index
    %25 = vector.load %arg5[%c3_29, %c0_30, %c0_31] : memref<11x8x768xf32, #tpu.memory_space<vmem>>, vector<1x8x768xf32>
    %26 = vector.shape_cast %25 : vector<1x8x768xf32> to vector<8x768xf32>
    %27 = arith.subf %24, %26 : vector<8x768xf32>
    %28 = arith.maximumf %22, %27 : vector<8x768xf32>
    %c4 = arith.constant 4 : index
    %c0_32 = arith.constant 0 : index
    %c0_33 = arith.constant 0 : index
    %29 = vector.load %arg4[%c4, %c0_32, %c0_33] : memref<11x8x768xf32, #tpu.memory_space<vmem>>, vector<1x8x768xf32>
    %30 = vector.shape_cast %29 : vector<1x8x768xf32> to vector<8x768xf32>
    %c4_34 = arith.constant 4 : index
    %c0_35 = arith.constant 0 : index
    %c0_36 = arith.constant 0 : index
    %31 = vector.load %arg5[%c4_34, %c0_35, %c0_36] : memref<11x8x768xf32, #tpu.memory_space<vmem>>, vector<1x8x768xf32>
    %32 = vector.shape_cast %31 : vector<1x8x768xf32> to vector<8x768xf32>
    %33 = arith.subf %30, %32 : vector<8x768xf32>
    %34 = arith.maximumf %28, %33 : vector<8x768xf32>
    %c5 = arith.constant 5 : index
    %c0_37 = arith.constant 0 : index
    %c0_38 = arith.constant 0 : index
    %35 = vector.load %arg4[%c5, %c0_37, %c0_38] : memref<11x8x768xf32, #tpu.memory_space<vmem>>, vector<1x8x768xf32>
    %36 = vector.shape_cast %35 : vector<1x8x768xf32> to vector<8x768xf32>
    %c5_39 = arith.constant 5 : index
    %c0_40 = arith.constant 0 : index
    %c0_41 = arith.constant 0 : index
    %37 = vector.load %arg5[%c5_39, %c0_40, %c0_41] : memref<11x8x768xf32, #tpu.memory_space<vmem>>, vector<1x8x768xf32>
    %38 = vector.shape_cast %37 : vector<1x8x768xf32> to vector<8x768xf32>
    %39 = arith.subf %36, %38 : vector<8x768xf32>
    %40 = arith.maximumf %34, %39 : vector<8x768xf32>
    %c6 = arith.constant 6 : index
    %c0_42 = arith.constant 0 : index
    %c0_43 = arith.constant 0 : index
    %41 = vector.load %arg4[%c6, %c0_42, %c0_43] : memref<11x8x768xf32, #tpu.memory_space<vmem>>, vector<1x8x768xf32>
    %42 = vector.shape_cast %41 : vector<1x8x768xf32> to vector<8x768xf32>
    %c6_44 = arith.constant 6 : index
    %c0_45 = arith.constant 0 : index
    %c0_46 = arith.constant 0 : index
    %43 = vector.load %arg5[%c6_44, %c0_45, %c0_46] : memref<11x8x768xf32, #tpu.memory_space<vmem>>, vector<1x8x768xf32>
    %44 = vector.shape_cast %43 : vector<1x8x768xf32> to vector<8x768xf32>
    %45 = arith.subf %42, %44 : vector<8x768xf32>
    %46 = arith.maximumf %40, %45 : vector<8x768xf32>
    %c7 = arith.constant 7 : index
    %c0_47 = arith.constant 0 : index
    %c0_48 = arith.constant 0 : index
    %47 = vector.load %arg4[%c7, %c0_47, %c0_48] : memref<11x8x768xf32, #tpu.memory_space<vmem>>, vector<1x8x768xf32>
    %48 = vector.shape_cast %47 : vector<1x8x768xf32> to vector<8x768xf32>
    %c7_49 = arith.constant 7 : index
    %c0_50 = arith.constant 0 : index
    %c0_51 = arith.constant 0 : index
    %49 = vector.load %arg5[%c7_49, %c0_50, %c0_51] : memref<11x8x768xf32, #tpu.memory_space<vmem>>, vector<1x8x768xf32>
    %50 = vector.shape_cast %49 : vector<1x8x768xf32> to vector<8x768xf32>
    %51 = arith.subf %48, %50 : vector<8x768xf32>
    %52 = arith.maximumf %46, %51 : vector<8x768xf32>
    %c8 = arith.constant 8 : index
    %c0_52 = arith.constant 0 : index
    %c0_53 = arith.constant 0 : index
    %53 = vector.load %arg4[%c8, %c0_52, %c0_53] : memref<11x8x768xf32, #tpu.memory_space<vmem>>, vector<1x8x768xf32>
    %54 = vector.shape_cast %53 : vector<1x8x768xf32> to vector<8x768xf32>
    %c8_54 = arith.constant 8 : index
    %c0_55 = arith.constant 0 : index
    %c0_56 = arith.constant 0 : index
    %55 = vector.load %arg5[%c8_54, %c0_55, %c0_56] : memref<11x8x768xf32, #tpu.memory_space<vmem>>, vector<1x8x768xf32>
    %56 = vector.shape_cast %55 : vector<1x8x768xf32> to vector<8x768xf32>
    %57 = arith.subf %54, %56 : vector<8x768xf32>
    %58 = arith.maximumf %52, %57 : vector<8x768xf32>
    %c9 = arith.constant 9 : index
    %c0_57 = arith.constant 0 : index
    %c0_58 = arith.constant 0 : index
    %59 = vector.load %arg4[%c9, %c0_57, %c0_58] : memref<11x8x768xf32, #tpu.memory_space<vmem>>, vector<1x8x768xf32>
    %60 = vector.shape_cast %59 : vector<1x8x768xf32> to vector<8x768xf32>
    %c9_59 = arith.constant 9 : index
    %c0_60 = arith.constant 0 : index
    %c0_61 = arith.constant 0 : index
    %61 = vector.load %arg5[%c9_59, %c0_60, %c0_61] : memref<11x8x768xf32, #tpu.memory_space<vmem>>, vector<1x8x768xf32>
    %62 = vector.shape_cast %61 : vector<1x8x768xf32> to vector<8x768xf32>
    %63 = arith.subf %60, %62 : vector<8x768xf32>
    %64 = arith.maximumf %58, %63 : vector<8x768xf32>
    %c10 = arith.constant 10 : index
    %c0_62 = arith.constant 0 : index
    %c0_63 = arith.constant 0 : index
    %65 = vector.load %arg4[%c10, %c0_62, %c0_63] : memref<11x8x768xf32, #tpu.memory_space<vmem>>, vector<1x8x768xf32>
    %66 = vector.shape_cast %65 : vector<1x8x768xf32> to vector<8x768xf32>
    %c10_64 = arith.constant 10 : index
    %c0_65 = arith.constant 0 : index
    %c0_66 = arith.constant 0 : index
    %67 = vector.load %arg5[%c10_64, %c0_65, %c0_66] : memref<11x8x768xf32, #tpu.memory_space<vmem>>, vector<1x8x768xf32>
    %68 = vector.shape_cast %67 : vector<1x8x768xf32> to vector<8x768xf32>
    %69 = arith.subf %66, %68 : vector<8x768xf32>
    %70 = arith.maximumf %64, %69 : vector<8x768xf32>
    %cst = arith.constant 1.000000e+00 : f32
    %71 = vector.broadcast %cst : f32 to vector<8x768xf32>
    %72 = arith.mulf %71, %70 : vector<8x768xf32>
    %73 = arith.mulf %72, %70 : vector<8x768xf32>
    %cst_67 = arith.constant dense<0.000000e+00> : vector<24x768xf32>
    %74 = tpu.matmul %4, %0, %cst_67 {dimension_numbers = #tpu.dot_dimension_numbers<[1], [0], [0], [1], [0, 0, 1, 1], [], []>} : vector<24x8xf32>, vector<8x768xf32>, vector<24x768xf32> -> vector<24x768xf32>
    %cst_68 = arith.constant dense<0.000000e+00> : vector<24x768xf32>
    %75 = tpu.matmul %4, %1, %cst_68 {dimension_numbers = #tpu.dot_dimension_numbers<[1], [0], [0], [1], [0, 0, 1, 1], [], []>} : vector<24x8xf32>, vector<8x768xf32>, vector<24x768xf32> -> vector<24x768xf32>
    %76 = arith.subf %74, %2 : vector<24x768xf32>
    %77 = arith.mulf %76, %76 : vector<24x768xf32>
    %cst_69 = arith.constant dense<0.000000e+00> : vector<24x768xf32>
    %78 = tpu.matmul %5, %77, %cst_69 {dimension_numbers = #tpu.dot_dimension_numbers<[1], [0], [0], [1], [0, 0, 1, 1], [], []>} : vector<24x24xf32>, vector<24x768xf32>, vector<24x768xf32> -> vector<24x768xf32>
    %cst_70 = arith.constant dense<0.000000e+00> : vector<24x768xf32>
    %79 = tpu.matmul %4, %73, %cst_70 {dimension_numbers = #tpu.dot_dimension_numbers<[1], [0], [0], [1], [0, 0, 1, 1], [], []>} : vector<24x8xf32>, vector<8x768xf32>, vector<24x768xf32> -> vector<24x768xf32>
    %80 = arith.maximumf %78, %79 : vector<24x768xf32>
    %cst_71 = arith.constant -5.000000e-01 : f32
    %81 = vector.broadcast %cst_71 : f32 to vector<24x768xf32>
    %82 = arith.mulf %80, %81 : vector<24x768xf32>
    %83 = math.exp %82 : vector<24x768xf32>
    %84 = arith.subf %75, %3 : vector<24x768xf32>
    %85 = math.absf %84 : vector<24x768xf32>
    %86 = arith.mulf %83, %85 : vector<24x768xf32>
    %87 = vector.shape_cast %86 : vector<24x768xf32> to vector<1x24x768xf32>
    %cst_72 = arith.constant dense<0.000000e+00> : vector<1xf32>
    %88 = vector.multi_reduction <add>, %87, %cst_72 [1, 2] : vector<1x24x768xf32> to vector<1xf32>
    %89 = vector.shape_cast %88 : vector<1xf32> to vector<1x1x1xf32>
    %90 = vector.extract %89[0, 0, 0] : f32 from vector<1x1x1xf32>
    %cst_73 = arith.constant 5.000000e-01 : f32
    %91 = arith.mulf %90, %cst_73 : f32
    %92 = arith.subf %0, %1 : vector<8x768xf32>
    %93 = arith.mulf %92, %92 : vector<8x768xf32>
    %94 = vector.shape_cast %93 : vector<8x768xf32> to vector<1x8x768xf32>
    %cst_74 = arith.constant dense<0.000000e+00> : vector<1xf32>
    %95 = vector.multi_reduction <add>, %94, %cst_74 [1, 2] : vector<1x8x768xf32> to vector<1xf32>
    %96 = vector.shape_cast %95 : vector<1xf32> to vector<1x1x1xf32>
    %97 = vector.extract %96[0, 0, 0] : f32 from vector<1x1x1xf32>
    %cst_75 = arith.constant 1.000000e-01 : f32
    %98 = arith.mulf %cst_75, %97 : f32
    %cst_76 = arith.constant 5.000000e-01 : f32
    %99 = arith.mulf %98, %cst_76 : f32
    %100 = arith.addf %91, %99 : f32
    %cst_77 = arith.constant 1.000000e+00 : f32
    %101 = arith.mulf %100, %cst_77 : f32
    %c0_78 = arith.constant 0 : index
    %c0_79 = arith.constant 0 : index
    %102 = memref.load %arg8[%c0_78, %c0_79] : memref<1x1xf32, #tpu.memory_space<smem>>
    memref.store %101, %arg8[%c0_78, %c0_79] : memref<1x1xf32, #tpu.memory_space<smem>>
    return
  }
}

</mosaic_0001>

<bundles_post_ra>
// kernel: acte_loss_v3.1
= control target key start
LH: loop header
LB: loop body
LE: loop exit
PB: predicated region body
PF: predicated region fallthrough
CT: control target
= control target key end

     0   :  { %vm368_vm0 = vcmask 64512   ;;  %s2467_s0 = inlined_call_operand.vmem [shape: f32[8,768], index: 0, kind: input, shape index: {}]   ;;  %s2468_s1 = inlined_call_operand.vmem [shape: f32[8,768], index: 1, kind: input, shape index: {}]   ;;  %s2469_s2 = inlined_call_operand.vmem [shape: f32[24,768], index: 2, kind: input, shape index: {}]   ;;  %s2470_s3 = inlined_call_operand.vmem [shape: f32[24,768], index: 3, kind: input, shape index: {}]   ;;  %s2471_s4 = inlined_call_operand.vmem [shape: f32[11,8,768], index: 4, kind: input, shape index: {}]   ;;  %s2472_s5 = inlined_call_operand.vmem [shape: f32[11,8,768], index: 5, kind: input, shape index: {}]   ;;  %s2473_s6 = inlined_call_operand.vmem [shape: f32[24,8], index: 6, kind: input, shape index: {}]   ;;  %s2474_s7 = inlined_call_operand.vmem [shape: f32[24,24], index: 7, kind: input, shape index: {}]   ;;  %s2475_s8 = inlined_call_operand.hbm [shape: f32[1,1], index: 8, kind: output, shape index: {}]  }
   0x1   :  { %v30_v0 = vld [vmem:[%s2467_s0] sm:$0xff]  ;;  %v31_v1 = vld [vmem:[%s2467_s0 + $0x8] sm:$0xff]  ;;  %v32_v2 = vld [vmem:[%s2467_s0 + $0x10] sm:$0xff] }
   0x2   :  { %393 = vmatpush.msra.mxu0 %v30_v0  ;;  %419 = vmatpush.msra.mxu1 %v31_v1  ;;  %v38_v3 = vld [vmem:[%s2468_s1 + $0x10] sm:$0xff]  ;;  %v33_v4 = vld [vmem:[%s2467_s0 + $0x18] sm:$0xff]  ;;  %v1563_v8 = vld [vmem:[%s2473_s6] sm:$0xff] }
   0x3   :  { %v39_v5 = vld [vmem:[%s2468_s1 + $0x18] sm:$0xff]  ;;  %445 = vmatpush.msra.mxu2 %v32_v2  ;;  %v1203_v6 = vsub.f32 %v32_v2, %v38_v3  ;;  %471 = vmatpush.msra.mxu3 %v33_v4  ;;  %v34_v9 = vld [vmem:[%s2467_s0 + $0x20] sm:$0xff]  ;;  %v35_v11 = vld [vmem:[%s2467_s0 + $0x28] sm:$0xff] }
   0x4   :  { %v1558_v7 = vsub.f32 %v33_v4, %v39_v5  ;;  %1367 = vmatmul.msk.f32.vlgmr.msra.gmra.mxu0 %vm368_vm0, %v1563_v8  ;;  %1370 = vmatmul.msk.f32.vlgmr.msra.gmra.mxu1 %vm368_vm0, %v1563_v8  ;;  %v40_v10 = vld [vmem:[%s2468_s1 + $0x20] sm:$0xff]  ;;  %v41_v13 = vld [vmem:[%s2468_s1 + $0x28] sm:$0xff] }
   0x5   :  { %1373 = vmatmul.msk.f32.vlgmr.msra.gmra.mxu2 %vm368_vm0, %v1563_v8  ;;  %1376 = vmatmul.msk.f32.vlgmr.msra.gmra.mxu3 %vm368_vm0, %v1563_v8  ;;  %v1582_v12 = vsub.f32 %v34_v9, %v40_v10 }
   0x6   :  { %13 = vsyncpa [#allocation3], 0  ;;  %497 = vmatpush.msrb.mxu0 %v34_v9  ;;  %523 = vmatpush.msrb.mxu1 %v35_v11  ;;  %v1587_v14 = vsub.f32 %v35_v11, %v41_v13  ;;  %v1592_v15 = vld [vmem:[%s2473_s6 + $0x8] sm:$0xff]  ;;  %v36_v16 = vld [vmem:[%s2468_s1] sm:$0xff]  ;;  %v1209_v20 = vmul.f32 %v1203_v6, %v1203_v6  ;;  %vm726_vm1 = vcmask 195584   ;;  %s1237_s20 = sshll.u32 %s2475_s8, 4  ;;  %s1238_s20 = int_to_ptr.hbm [resolvable:$true] %s1237_s20 }
   0x7   :  { %v37_v17 = vld [vmem:[%s2468_s1 + $0x8] sm:$0xff]  ;;  %v1201_v18 = vsub.f32 %v30_v0, %v36_v16  ;;  %549 = vmatpush.msrb.mxu2 %v36_v16  ;;  %v1611_v23 = vld [vmem:[%s2473_s6 + $0x10] sm:$0xff]  ;;  %v84_v26 = vld [vmem:[%s2471_s4] sm:$0xff]  ;;  %s1494_s23 = smov [#allocation2]  }
   0x8   :  { %601 = vmatpush.msra.mxu0 %v38_v3  ;;  %627 = vmatpush.msra.mxu1 %v39_v5  ;;  %v1202_v19 = vsub.f32 %v31_v1, %v37_v17  ;;  %v90_v27 = vld [vmem:[%s2472_s5] sm:$0xff]  ;;  %v1247_v28 = vld [vmem:[%s2471_s4 + $0x30] sm:$0xff]  ;;  %v85_v33 = vld [vmem:[%s2471_s4 + $0x8] sm:$0xff] }
   0x9   :  { %575 = vmatpush.msrb.mxu3 %v37_v17  ;;  %v1207_v21 = vmul.f32 %v1201_v18, %v1201_v18  ;;  %653 = vmatpush.msra.mxu2 %v40_v10  ;;  %v96_v31 = vsub.f32 %v84_v26, %v90_v27  ;;  %v1253_v32 = vld [vmem:[%s2472_s5 + $0x30] sm:$0xff]  ;;  %v1259_v35 = vld [vmem:[%s2471_s4 + $0x60] sm:$0xff]  ;;  %v91_v37 = vld [vmem:[%s2472_s5 + $0x8] sm:$0xff] }
   0xa   :  { %v1208_v22 = vmul.f32 %v1202_v19, %v1202_v19  ;;  %v116_v34 = vsub.f32 %v1247_v28, %v1253_v32  ;;  %v1265_v36 = vld [vmem:[%s2472_s5 + $0x60] sm:$0xff]  ;;  %v97_v39 = vsub.f32 %v85_v33, %v91_v37  ;;  %v1248_v40 = vld [vmem:[%s2471_s4 + $0x38] sm:$0xff]  ;;  %v1271_v43 = vld [vmem:[%s2471_s4 + $0x90] sm:$0xff] }
   0xb   :  { %679 = vmatpush.msra.mxu3 %v41_v13  ;;  %v142_v38 = vsub.f32 %v1259_v35, %v1265_v36  ;;  %v1254_v41 = vld [vmem:[%s2472_s5 + $0x38] sm:$0xff]  ;;  %v1277_v45 = vld [vmem:[%s2472_s5 + $0x90] sm:$0xff]  ;;  %v1260_v46 = vld [vmem:[%s2471_s4 + $0x68] sm:$0xff] }
   0xc   :  { %1368 = vmatmul.msk.f32.gmra.mxu0 %vm368_vm0, %v1592_v15  ;;  %1371 = vmatmul.msk.f32.gmra.mxu1 %vm368_vm0, %v1592_v15  ;;  %v1213_v24 = vadd.f32 %v1208_v22, %v1207_v21  ;;  %v122_v42 = vmax.f32 %v96_v31, %v116_v34  ;;  %v117_v44 = vsub.f32 %v1248_v40, %v1254_v41  ;;  %v1266_v47 = vld [vmem:[%s2472_s5 + $0x68] sm:$0xff]  ;;  %v1283_v50 = vld [vmem:[%s2471_s4 + $0xc0] sm:$0xff]  ;;  %v1272_v54 = vld [vmem:[%s2471_s4 + $0x98] sm:$0xff] }
   0xd   :  { %1374 = vmatmul.msk.f32.gmra.mxu2 %vm368_vm0, %v1592_v15  ;;  %1377 = vmatmul.msk.f32.gmra.mxu3 %vm368_vm0, %v1592_v15  ;;  %v168_v49 = vsub.f32 %v1271_v43, %v1277_v45  ;;  %v1289_v51 = vld [vmem:[%s2472_s5 + $0xc0] sm:$0xff]  ;;  %v143_v53 = vsub.f32 %v1260_v46, %v1266_v47  ;;  %v1278_v56 = vld [vmem:[%s2472_s5 + $0x98] sm:$0xff]  ;;  %v1284_v57 = vld [vmem:[%s2471_s4 + $0xc8] sm:$0xff] }
   0xe   :  { %v1613_v25 = vadd.f32 %v1213_v24, %v1209_v20  ;;  %v148_v48 = vmax.f32 %v122_v42, %v142_v38  ;;  %v123_v52 = vmax.f32 %v97_v39, %v117_v44  ;;  %v194_v55 = vsub.f32 %v1283_v50, %v1289_v51  ;;  %v1290_v58 = vld [vmem:[%s2472_s5 + $0xc8] sm:$0xff]  ;;  %v1295_v62 = vld [vmem:[%s2471_s4 + $0xf0] sm:$0xff]  ;;  %v1296_v3 = vld [vmem:[%s2471_s4 + $0xf8] sm:$0xff] }
   0xf   :  { %v1301_v63 = vld [vmem:[%s2472_s5 + $0xf0] sm:$0xff]  ;;  %v169_v1 = vsub.f32 %v1272_v54, %v1278_v56  ;;  %v195_v2 = vsub.f32 %v1284_v57, %v1290_v58  ;;  %v42_v4 = vld [vmem:[%s2469_s2] sm:$0xff]  ;;  %v1302_v10 = vld [vmem:[%s2472_s5 + $0xf8] sm:$0xff] }
  0x10   :  { %v174_v61 = vmax.f32 %v148_v48, %v168_v49  ;;  %v149_v0 = vmax.f32 %v123_v52, %v143_v53  ;;  %v220_v9 = vsub.f32 %v1295_v62, %v1301_v63  ;;  %v43_v11 = vld [vmem:[%s2469_s2 + $0x8] sm:$0xff]  ;;  %v1307_v16 = vld [vmem:[%s2471_s4 + $0x120] sm:$0xff]  ;;  %v49_v19 = vld [vmem:[%s2469_s2 + $0x38] sm:$0xff]  ;;  %v221_v21 = vsub.f32 %v1296_v3, %v1302_v10 }
  0x11   :  { %v1313_v17 = vld [vmem:[%s2472_s5 + $0x120] sm:$0xff]  ;;  %v1308_v22 = vld [vmem:[%s2471_s4 + $0x128] sm:$0xff]  ;;  %v1319_v27 = vld [vmem:[%s2471_s4 + $0x150] sm:$0xff] }
  0x12   :  { %v200_v13 = vmax.f32 %v174_v61, %v194_v55  ;;  %v175_v18 = vmax.f32 %v149_v0, %v169_v1  ;;  %v246_v20 = vsub.f32 %v1307_v16, %v1313_v17  ;;  %v1314_v24 = vld [vmem:[%s2472_s5 + $0x128] sm:$0xff]  ;;  %v1325_v28 = vld [vmem:[%s2472_s5 + $0x150] sm:$0xff]  ;;  %v1320_v32 = vld [vmem:[%s2471_s4 + $0x158] sm:$0xff] }
  0x13   :  { %v48_v34 = vld [vmem:[%s2469_s2 + $0x30] sm:$0xff]  ;;  %v272_v35 = vsub.f32 %v1319_v27, %v1325_v28  ;;  %v247_v36 = vsub.f32 %v1308_v22, %v1314_v24  ;;  %v1326_v37 = vld [vmem:[%s2472_s5 + $0x158] sm:$0xff]  ;;  %v1331_v40 = vld [vmem:[%s2471_s4 + $0x180] sm:$0xff] }
  0x14   :  { %1369 = vmatmul.msk.f32.gmra.mxu0 %vm368_vm0, %v1611_v23  ;;  %1372 = vmatmul.msk.f32.gmra.mxu1 %vm368_vm0, %v1611_v23  ;;  %v226_v26 = vmax.f32 %v200_v13, %v220_v9  ;;  %v201_v31 = vmax.f32 %v175_v18, %v195_v2  ;;  %v44_v38 = vld [vmem:[%s2469_s2 + $0x10] sm:$0xff]  ;;  %v273_v42 = vsub.f32 %v1320_v32, %v1326_v37  ;;  %v1332_v43 = vld [vmem:[%s2471_s4 + $0x188] sm:$0xff]  ;;  %v54_v46 = vld [vmem:[%s2469_s2 + $0x60] sm:$0xff] }
  0x15   :  { %1375 = vmatmul.msk.f32.gmra.mxu2 %vm368_vm0, %v1611_v23  ;;  %1378 = vmatmul.msk.f32.gmra.mxu3 %vm368_vm0, %v1611_v23  ;;  %v55_v47 = vld [vmem:[%s2469_s2 + $0x68] sm:$0xff]  ;;  %v45_v50 = vld [vmem:[%s2469_s2 + $0x18] sm:$0xff]  ;;  %v1343_v53 = vld [vmem:[%s2471_s4 + $0x1b0] sm:$0xff] }
  0x16   :  { %v252_v39 = vmax.f32 %v226_v26, %v246_v20  ;;  %v227_v41 = vmax.f32 %v201_v31, %v221_v21  ;;  %v1338_v49 = vld [vmem:[%s2472_s5 + $0x188] sm:$0xff]  ;;  %v1349_v54 = vld [vmem:[%s2472_s5 + $0x1b0] sm:$0xff]  ;;  %v50_v61 = vld [vmem:[%s2469_s2 + $0x40] sm:$0xff] }
  0x17   :  { %v299_v56 = vsub.f32 %v1332_v43, %v1338_v49  ;;  %v324_v0 = vsub.f32 %v1343_v53, %v1349_v54  ;;  %v1344_v1 = vld [vmem:[%s2471_s4 + $0x1b8] sm:$0xff]  ;;  %v51_v3 = vld [vmem:[%s2469_s2 + $0x48] sm:$0xff]  ;;  %v1833_v9 = vld [vmem:[%s2471_s4 + $0x1e0] sm:$0xff] }
  0x18   :  { %v278_v52 = vmax.f32 %v252_v39, %v272_v35  ;;  %v253_v55 = vmax.f32 %v227_v41, %v247_v36  ;;  %v1350_v2 = vld [vmem:[%s2472_s5 + $0x1b8] sm:$0xff]  ;;  %v1838_v10 = vld [vmem:[%s2472_s5 + $0x1e0] sm:$0xff]  ;;  %v1843_v13 = vld [vmem:[%s2471_s4 + $0x1e8] sm:$0xff] }
  0x19   :  { %v1852_v20 = vld [vmem:[%s2472_s5 + $0x1e8] sm:$0xff]  ;;  %v86_v21 = vld [vmem:[%s2471_s4 + $0x10] sm:$0xff]  ;;  %v325_v28 = vsub.f32 %v1344_v1, %v1350_v2  ;;  %v1249_v31 = vld [vmem:[%s2471_s4 + $0x40] sm:$0xff]  ;;  %v350_v41 = vsub.f32 %v1833_v9, %v1838_v10 }
  0x1a   :  { %v92_v22 = vld [vmem:[%s2472_s5 + $0x10] sm:$0xff]  ;;  %v1255_v32 = vld [vmem:[%s2472_s5 + $0x40] sm:$0xff]  ;;  %v87_v39 = vld [vmem:[%s2471_s4 + $0x18] sm:$0xff] }
  0x1b   :  { %v98_v36 = vsub.f32 %v86_v21, %v92_v22  ;;  %v118_v37 = vsub.f32 %v1249_v31, %v1255_v32  ;;  %v1273_v43 = vld [vmem:[%s2471_s4 + $0xa0] sm:$0xff]  ;;  %v1285_v54 = vld [vmem:[%s2471_s4 + $0xd0] sm:$0xff]  ;;  %v1955_v22 = vld [vmem:[%s2471_s4 + $0x108] sm:$0xff] }
  0x1c   :  { %1379 = vmatmul.msk.f32.vlgmr.msrb.gmra.mxu0 %vm368_vm0, %v1563_v8  ;;  %1382 = vmatmul.msk.f32.vlgmr.msrb.gmra.mxu1 %vm368_vm0, %v1563_v8  ;;  %v1971_v32 = vld [vmem:[%s2471_s4 + $0x20] sm:$0xff] }
  0x1d   :  { %1385 = vmatmul.msk.f32.vlgmr.msrb.gmra.mxu2 %vm368_vm0, %v1563_v8  ;;  %1388 = vmatmul.msk.f32.vlgmr.msrb.gmra.mxu3 %vm368_vm0, %v1563_v8  ;;  %v124_v49 = vmax.f32 %v98_v36, %v118_v37  ;;  %v1976_v36 = vld [vmem:[%s2472_s5 + $0x20] sm:$0xff]  ;;  %v1981_v37 = vld [vmem:[%s2471_s4 + $0x50] sm:$0xff] }
  0x24   :  { %1380 = vmatmul.msk.f32.gmra.mxu0 %vm368_vm0, %v1592_v15  ;;  %1383 = vmatmul.msk.f32.gmra.mxu1 %vm368_vm0, %v1592_v15 }
  0x25   :  { %1386 = vmatmul.msk.f32.gmra.mxu2 %vm368_vm0, %v1592_v15  ;;  %1389 = vmatmul.msk.f32.gmra.mxu3 %vm368_vm0, %v1592_v15 }
  0x2c   :  { %1381 = vmatmul.msk.f32.gmra.mxu0 %vm368_vm0, %v1611_v23  ;;  %1384 = vmatmul.msk.f32.gmra.mxu1 %vm368_vm0, %v1611_v23 }
  0x2d   :  { %1387 = vmatmul.msk.f32.gmra.mxu2 %vm368_vm0, %v1611_v23  ;;  %1390 = vmatmul.msk.f32.gmra.mxu3 %vm368_vm0, %v1611_v23 }
  0x34   :  { %1391 = vmatmul.msk.f32.vlgmr.msra.gmra.mxu0 %vm368_vm0, %v1563_v8  ;;  %1394 = vmatmul.msk.f32.vlgmr.msra.gmra.mxu1 %vm368_vm0, %v1563_v8 }
  0x35   :  { %1397 = vmatmul.msk.f32.vlgmr.msra.gmra.mxu2 %vm368_vm0, %v1563_v8  ;;  %1400 = vmatmul.msk.f32.vlgmr.msra.gmra.mxu3 %vm368_vm0, %v1563_v8 }
  0x3c   :  { %1392 = vmatmul.msk.f32.gmra.mxu0 %vm368_vm0, %v1592_v15  ;;  %1395 = vmatmul.msk.f32.gmra.mxu1 %vm368_vm0, %v1592_v15 }
  0x3d   :  { %1398 = vmatmul.msk.f32.gmra.mxu2 %vm368_vm0, %v1592_v15  ;;  %1401 = vmatmul.msk.f32.gmra.mxu3 %vm368_vm0, %v1592_v15 }
  0x44   :  { %1393 = vmatmul.msk.f32.gmra.mxu0 %vm368_vm0, %v1611_v23  ;;  %1396 = vmatmul.msk.f32.gmra.mxu1 %vm368_vm0, %v1611_v23 }
  0x45   :  { %1399 = vmatmul.msk.f32.gmra.mxu2 %vm368_vm0, %v1611_v23  ;;  %1402 = vmatmul.msk.f32.gmra.mxu3 %vm368_vm0, %v1611_v23 }
  0x81   :  { %v395_v29 = vpop.f32.mrf.mxu0  ;;  %v1680_v30 = vpop.f32.mrf.mxu1 }
  0x82   :  { %v690_v33 = vsub.f32 %v395_v29, %v42_v4  ;;  %v1337_v29 = vld [vmem:[%s2472_s5 + $0x180] sm:$0xff]  ;;  %v691_v44 = vsub.f32 %v1680_v30, %v43_v11  ;;  %v279_v11 = vmax.f32 %v253_v55, %v273_v42  ;;  %v1291_v55 = vld [vmem:[%s2472_s5 + $0xd0] sm:$0xff] }
  0x83   :  { %v298_v48 = vsub.f32 %v1331_v40, %v1337_v29  ;;  %v93_v40 = vld [vmem:[%s2472_s5 + $0x18] sm:$0xff] }
  0x84   :  { %v1816_v57 = vmul.f32 %v690_v33, %v690_v33  ;;  %v709_v16 = vmul.f32 %v691_v44, %v691_v44  ;;  %v305_v27 = vmax.f32 %v279_v11, %v299_v56  ;;  %v1261_v33 = vld [vmem:[%s2471_s4 + $0x70] sm:$0xff]  ;;  %v1279_v44 = vld [vmem:[%s2472_s5 + $0xa0] sm:$0xff]  ;;  %v99_v56 = vsub.f32 %v87_v39, %v93_v40  ;;  %v1993_v40 = vld [vmem:[%s2474_s7 + $0x8] sm:$0xff] }
  0x88   :  { %v1733_v59 = vpop.f32.mrf.mxu2  ;;  %v1735_v60 = vpop.f32.mrf.mxu3 }
  0x89   :  { %v398_v5 = vpop.f32.mrf.mxu0  ;;  %v424_v6 = vpop.f32.mrf.mxu1  ;;  %v692_v17 = vsub.f32 %v1733_v59, %v44_v38  ;;  %v1847_v18 = vsub.f32 %v1735_v60, %v45_v50  ;;  %v56_v59 = vld [vmem:[%s2469_s2 + $0x70] sm:$0xff]  ;;  %v57_v60 = vld [vmem:[%s2469_s2 + $0x78] sm:$0xff]  ;;  %v170_v50 = vsub.f32 %v1273_v43, %v1279_v44 }
  0x8a   :  { %v697_v45 = vsub.f32 %v424_v6, %v49_v19  ;;  %v696_v58 = vsub.f32 %v398_v5, %v48_v34  ;;  %v304_v6 = vmax.f32 %v278_v52, %v298_v48  ;;  %v1267_v38 = vld [vmem:[%s2472_s5 + $0x70] sm:$0xff]  ;;  %v351_v48 = vsub.f32 %v1843_v13, %v1852_v20  ;;  %v1297_v13 = vld [vmem:[%s2471_s4 + $0x100] sm:$0xff]  ;;  %v1941_v20 = vld [vmem:[%s2471_s4 + $0xd8] sm:$0xff] }
  0x8b   :  { %v144_v42 = vsub.f32 %v1261_v33, %v1267_v38  ;;  %v710_v9 = vmul.f32 %v692_v17, %v692_v17  ;;  %v1986_v38 = vld [vmem:[%s2472_s5 + $0x50] sm:$0xff]  ;;  %v711_v39 = vmul.f32 %v1847_v18, %v1847_v18 }
  0x8c   :  { %v715_v19 = vmul.f32 %v697_v45, %v697_v45  ;;  %v714_v34 = vmul.f32 %v696_v58, %v696_v58  ;;  %v330_v29 = vmax.f32 %v304_v6, %v324_v0  ;;  %v1250_v45 = vld [vmem:[%s2471_s4 + $0x48] sm:$0xff] }
  0x8d   :  { %v150_v2 = vmax.f32 %v124_v49, %v144_v42  ;;  %v1929_v6 = vld [vmem:[%s2472_s5 + $0xa8] sm:$0xff]  ;;  %v1327_v42 = vld [vmem:[%s2472_s5 + $0x160] sm:$0xff]  ;;  %v1316_v49 = vld [vmem:[%s2472_s5 + $0x138] sm:$0xff] }
  0x8e   :  { %v356_v11 = vmax.f32 %v330_v29, %v350_v41  ;;  %v1321_v41 = vld [vmem:[%s2471_s4 + $0x160] sm:$0xff] }
  0x90   :  { %v450_v51 = vpop.f32.mrf.mxu2  ;;  %v476_v30 = vpop.f32.mrf.mxu3  ;;  %v362_v29 = vmul.f32 %v356_v11, %v356_v11  ;;  %v1345_v11 = vld [vmem:[%s2471_s4 + $0x1c0] sm:$0xff] }
  0x91   :  { %v401_v62 = vpop.f32.mrf.mxu0  ;;  %v427_v63 = vpop.f32.mrf.mxu1  ;;  %v698_v35 = vsub.f32 %v450_v51, %v50_v61  ;;  %v1256_v51 = vld [vmem:[%s2472_s5 + $0x48] sm:$0xff]  ;;  %v1262_v61 = vld [vmem:[%s2471_s4 + $0x78] sm:$0xff] }
  0x92   :  { %v702_v4 = vsub.f32 %v401_v62, %v54_v46  ;;  %v703_v5 = vsub.f32 %v427_v63, %v55_v47  ;;  %v699_v46 = vsub.f32 %v476_v30, %v51_v3  ;;  %v1898_v47 = vld [vmem:[%s2474_s7] sm:$0xff]  ;;  %v331_v30 = vmax.f32 %v305_v27, %v325_v28  ;;  %v1309_v27 = vld [vmem:[%s2471_s4 + $0x130] sm:$0xff] }
  0x93   :  { %v119_v58 = vsub.f32 %v1250_v45, %v1256_v51  ;;  %v196_v3 = vsub.f32 %v1285_v54, %v1291_v55  ;;  %v716_v10 = vmul.f32 %v698_v35, %v698_v35  ;;  %v1315_v28 = vld [vmem:[%s2472_s5 + $0x130] sm:$0xff]  ;;  %v274_v45 = vsub.f32 %v1321_v41, %v1327_v42 }
  0x94   :  { %v720_v24 = vmul.f32 %v702_v4, %v702_v4  ;;  %v721_v26 = vmul.f32 %v703_v5, %v703_v5  ;;  %v1268_v4 = vld [vmem:[%s2472_s5 + $0x78] sm:$0xff]  ;;  %v1924_v5 = vld [vmem:[%s2471_s4 + $0xa8] sm:$0xff]  ;;  %v100_v54 = vsub.f32 %v1971_v32, %v1976_v36  ;;  %v120_v55 = vsub.f32 %v1981_v37, %v1986_v38  ;;  %v1293_v32 = vld [vmem:[%s2472_s5 + $0xe0] sm:$0xff] }
  0x95   :  { %v125_v31 = vmax.f32 %v99_v56, %v119_v58  ;;  %v145_v35 = vsub.f32 %v1262_v61, %v1268_v4  ;;  %v171_v43 = vsub.f32 %v1924_v5, %v1929_v6  ;;  %v1269_v56 = vld [vmem:[%s2472_s5 + $0x80] sm:$0xff]  ;;  %v47_v61 = vld [vmem:[%s2469_s2 + $0x28] sm:$0xff]  ;;  %v1363_v36 = vld [vmem:[%s2472_s5 + $0x1f0] sm:$0xff] }
  0x96   :  { %749 = vmatpush.msrb.mxu0 %v720_v24  ;;  %775 = vmatpush.msrb.mxu1 %v721_v26  ;;  %v1960_v24 = vld [vmem:[%s2472_s5 + $0x108] sm:$0xff]  ;;  %v717_v26 = vmul.f32 %v699_v46, %v699_v46  ;;  %v46_v58 = vld [vmem:[%s2469_s2 + $0x20] sm:$0xff]  ;;  %v2113_v38 = vld [vmem:[%s2471_s4 + $0x1f8] sm:$0xff] }
  0x97   :  { %v151_v46 = vmax.f32 %v125_v31, %v145_v35  ;;  %v1287_v31 = vld [vmem:[%s2471_s4 + $0xe0] sm:$0xff] }
  0x98   :  { %v453_v52 = vpop.f32.mrf.mxu2  ;;  %v479_v53 = vpop.f32.mrf.mxu3  ;;  %750 = vmatpush.msrb.mxu0 %v714_v34  ;;  %776 = vmatpush.msrb.mxu1 %v715_v19  ;;  %v1303_v19 = vld [vmem:[%s2472_s5 + $0x100] sm:$0xff]  ;;  %v248_v34 = vsub.f32 %v1309_v27, %v1315_v28  ;;  %v2096_v27 = vld [vmem:[%s2471_s4 + $0x1f0] sm:$0xff] }
  0x99   :  { %v704_v62 = vsub.f32 %v453_v52, %v56_v59  ;;  %v705_v63 = vsub.f32 %v479_v53, %v57_v60  ;;  %v1914_v0 = vpop.f32.mrf.mxu0  ;;  %v1916_v1 = vpop.f32.mrf.mxu1  ;;  %v357_v59 = vmax.f32 %v331_v30, %v351_v48  ;;  %v222_v60 = vsub.f32 %v1297_v13, %v1303_v19  ;;  %v2008_v48 = vld [vmem:[%s2471_s4 + $0x138] sm:$0xff]  ;;  %v1333_v52 = vld [vmem:[%s2471_s4 + $0x190] sm:$0xff]  ;;  %v1351_v13 = vld [vmem:[%s2472_s5 + $0x1c0] sm:$0xff] }
  0x9a   :  { %751 = vmatpush.msrb.mxu0 %v1816_v57  ;;  %777 = vmatpush.msrb.mxu1 %v709_v16  ;;  %v176_v57 = vmax.f32 %v150_v2, %v170_v50  ;;  %v1950_v16 = vld [vmem:[%s2472_s5 + $0xd8] sm:$0xff]  ;;  %v2016_v50 = vld [vmem:[%s2471_s4 + $0x80] sm:$0xff]  ;;  %v1339_v53 = vld [vmem:[%s2472_s5 + $0x190] sm:$0xff]  ;;  %v223_v30 = vsub.f32 %v1955_v22, %v1960_v24  ;;  %v177_v6 = vmax.f32 %v151_v46, %v171_v43 }
  0x9b   :  { %v722_v21 = vmul.f32 %v704_v62, %v704_v62  ;;  %v723_v17 = vmul.f32 %v705_v63, %v705_v63  ;;  %1403 = vmatmul.msk.f32.vlgmr.msrb.gmra.mxu0 %vm726_vm1, %v1898_v47  ;;  %1406 = vmatmul.msk.f32.vlgmr.msrb.gmra.mxu1 %vm726_vm1, %v1898_v47  ;;  %v197_v18 = vsub.f32 %v1941_v20, %v1950_v16  ;;  %v52_v62 = vld [vmem:[%s2469_s2 + $0x50] sm:$0xff]  ;;  %v53_v2 = vld [vmem:[%s2469_s2 + $0x58] sm:$0xff]  ;;  %v2082_v22 = vld [vmem:[%s2471_s4 + $0x1c8] sm:$0xff] }
  0x9c   :  { %v202_v33 = vmax.f32 %v176_v57, %v196_v3  ;;  %v363_v51 = vmul.f32 %v357_v59, %v357_v59  ;;  %v300_v5 = vsub.f32 %v1333_v52, %v1339_v53  ;;  %v249_v19 = vsub.f32 %v2008_v48, %v1316_v49  ;;  %v2065_v20 = vld [vmem:[%s2471_s4 + $0x198] sm:$0xff]  ;;  %v2087_v24 = vld [vmem:[%s2472_s5 + $0x1c8] sm:$0xff]  ;;  %v1281_v59 = vld [vmem:[%s2472_s5 + $0xb0] sm:$0xff] }
  0x9d   :  { %801 = vmatpush.msrb.mxu2 %v722_v21  ;;  %827 = vmatpush.msrb.mxu3 %v723_v17  ;;  %v2070_v21 = vld [vmem:[%s2472_s5 + $0x198] sm:$0xff]  ;;  %v1275_v17 = vld [vmem:[%s2471_s4 + $0xb0] sm:$0xff]  ;;  %v203_v16 = vmax.f32 %v177_v6, %v197_v18  ;;  %v326_v35 = vsub.f32 %v1345_v11, %v1351_v13  ;;  %v2121_v41 = vsub.f32 %v1914_v0, %v46_v58  ;;  %v59_v18 = vld [vmem:[%s2469_s2 + $0x88] sm:$0xff] }
  0x9e   :  { %v228_v44 = vmax.f32 %v202_v33, %v222_v60  ;;  %v58_v33 = vld [vmem:[%s2469_s2 + $0x80] sm:$0xff]  ;;  %v2124_v42 = vsub.f32 %v1916_v1, %v47_v61  ;;  %v1305_v46 = vld [vmem:[%s2472_s5 + $0x110] sm:$0xff]  ;;  %v301_v48 = vsub.f32 %v2065_v20, %v2070_v21  ;;  %v89_v61 = vld [vmem:[%s2471_s4 + $0x28] sm:$0xff] }
  0x9f   :  { %802 = vmatpush.msrb.mxu2 %v716_v10  ;;  %828 = vmatpush.msrb.mxu3 %v717_v26  ;;  %v1322_v10 = vld [vmem:[%s2471_s4 + $0x168] sm:$0xff]  ;;  %v146_v26 = vsub.f32 %v2016_v50, %v1269_v56  ;;  %v229_v37 = vmax.f32 %v203_v16, %v223_v30  ;;  %v2138_v0 = vld [vmem:[%s2474_s7 + $0x10] sm:$0xff]  ;;  %v198_v50 = vsub.f32 %v1287_v31, %v1293_v32  ;;  %v1317_v52 = vld [vmem:[%s2472_s5 + $0x140] sm:$0xff] }
  0xa0   :  { %v254_v4 = vmax.f32 %v228_v44, %v248_v34  ;;  %v172_v44 = vsub.f32 %v1275_v17, %v1281_v59  ;;  %v352_v30 = vsub.f32 %v2096_v27, %v1363_v36  ;;  %v1323_v56 = vld [vmem:[%s2471_s4 + $0x170] sm:$0xff]  ;;  %v95_v6 = vld [vmem:[%s2472_s5 + $0x28] sm:$0xff]  ;;  %v1335_v27 = vld [vmem:[%s2471_s4 + $0x1a0] sm:$0xff] }
  0xa1   :  { %803 = vmatpush.msrb.mxu2 %v710_v9  ;;  %829 = vmatpush.msrb.mxu3 %v711_v39  ;;  %v502_v63 = vpop.f32.mrf.mxu0  ;;  %v528_v3 = vpop.f32.mrf.mxu1  ;;  %v1328_v9 = vld [vmem:[%s2472_s5 + $0x168] sm:$0xff]  ;;  %v2118_v39 = vld [vmem:[%s2472_s5 + $0x1f8] sm:$0xff]  ;;  %v255_v1 = vmax.f32 %v229_v37, %v249_v19  ;;  %v1329_v58 = vld [vmem:[%s2472_s5 + $0x170] sm:$0xff]  ;;  %v101_v19 = vsub.f32 %v89_v61, %v95_v6 }
  0xa2   :  { %1409 = vmatmul.msk.f32.vlgmr.msrb.gmra.mxu2 %vm726_vm1, %v1898_v47  ;;  %1412 = vmatmul.msk.f32.vlgmr.msrb.gmra.mxu3 %vm726_vm1, %v1898_v47  ;;  %v280_v57 = vmax.f32 %v254_v4, %v274_v45  ;;  %v701_v60 = vsub.f32 %v528_v3, %v53_v2  ;;  %v275_v28 = vsub.f32 %v1322_v10, %v1328_v9  ;;  %v1299_v45 = vld [vmem:[%s2471_s4 + $0x110] sm:$0xff]  ;;  %v1252_v10 = vld [vmem:[%s2471_s4 + $0x58] sm:$0xff]  ;;  %v1264_v20 = vld [vmem:[%s2471_s4 + $0x88] sm:$0xff] }
  0xa3   :  { %1404 = vmatmul.msk.f32.gmra.mxu0 %vm726_vm1, %v1993_v40  ;;  %1407 = vmatmul.msk.f32.gmra.mxu1 %vm726_vm1, %v1993_v40  ;;  %v700_v43 = vsub.f32 %v502_v63, %v52_v62  ;;  %v1258_v9 = vld [vmem:[%s2472_s5 + $0x58] sm:$0xff]  ;;  %v1270_v16 = vld [vmem:[%s2472_s5 + $0x88] sm:$0xff] }
  0xa4   :  { %907 = vmatpush.msra.mxu2 %v362_v29  ;;  %933 = vmatpush.msra.mxu3 %v363_v51  ;;  %v306_v34 = vmax.f32 %v280_v57, %v300_v5  ;;  %v126_v29 = vmax.f32 %v100_v54, %v120_v55  ;;  %v1311_v51 = vld [vmem:[%s2471_s4 + $0x140] sm:$0xff]  ;;  %v719_v53 = vmul.f32 %v701_v60, %v701_v60  ;;  %v1288_v36 = vld [vmem:[%s2471_s4 + $0xe8] sm:$0xff] }
  0xa5   :  { %v327_v54 = vsub.f32 %v2082_v22, %v2087_v24  ;;  %v353_v55 = vsub.f32 %v2113_v38, %v2118_v39  ;;  %v281_v3 = vmax.f32 %v255_v1, %v275_v28  ;;  %v224_v5 = vsub.f32 %v1299_v45, %v1305_v46  ;;  %v1276_v22 = vld [vmem:[%s2471_s4 + $0xb8] sm:$0xff]  ;;  %v1341_v28 = vld [vmem:[%s2472_s5 + $0x1a0] sm:$0xff]  ;;  %v1294_v37 = vld [vmem:[%s2472_s5 + $0xe8] sm:$0xff] }
  0xa6   :  { %v152_v49 = vmax.f32 %v126_v29, %v146_v26  ;;  %v332_v2 = vmax.f32 %v306_v34, %v326_v35  ;;  %v250_v57 = vsub.f32 %v1311_v51, %v1317_v52  ;;  %v1282_v24 = vld [vmem:[%s2472_s5 + $0xb8] sm:$0xff]  ;;  %v276_v60 = vsub.f32 %v1323_v56, %v1329_v58  ;;  %v1347_v39 = vld [vmem:[%s2471_s4 + $0x1d0] sm:$0xff]  ;;  %v1365_v51 = vld [vmem:[%s2472_s5 + $0x200] sm:$0xff] }
  0xa7   :  { %v307_v21 = vmax.f32 %v281_v3, %v301_v48  ;;  %v121_v31 = vsub.f32 %v1252_v10, %v1258_v9  ;;  %v147_v35 = vsub.f32 %v1264_v20, %v1270_v16  ;;  %v718_v38 = vmul.f32 %v700_v43, %v700_v43  ;;  %v1353_v29 = vld [vmem:[%s2472_s5 + $0x1d0] sm:$0xff]  ;;  %v1300_v43 = vld [vmem:[%s2471_s4 + $0x118] sm:$0xff]  ;;  %v1336_v9 = vld [vmem:[%s2471_s4 + $0x1a8] sm:$0xff] }
  0xa8   :  { %v178_v4 = vmax.f32 %v152_v49, %v172_v44  ;;  %v358_v32 = vmax.f32 %v332_v2, %v352_v30  ;;  %v173_v44 = vsub.f32 %v1276_v22, %v1282_v24  ;;  %v712_v45 = vmul.f32 %v2121_v41, %v2121_v41  ;;  %v1306_v49 = vld [vmem:[%s2472_s5 + $0x118] sm:$0xff]  ;;  %v1359_v41 = vld [vmem:[%s2471_s4 + $0x200] sm:$0xff]  ;;  %v1360_v22 = vld [vmem:[%s2471_s4 + $0x208] sm:$0xff] }
  0xa9   :  { %v505_v62 = vpop.f32.mrf.mxu0  ;;  %v531_v63 = vpop.f32.mrf.mxu1  ;;  %v302_v48 = vsub.f32 %v1335_v27, %v1341_v28  ;;  %v199_v30 = vsub.f32 %v1288_v36, %v1294_v37  ;;  %v328_v58 = vsub.f32 %v1347_v39, %v1353_v29  ;;  %v354_v2 = vsub.f32 %v1359_v41, %v1365_v51  ;;  %v1324_v3 = vld [vmem:[%s2471_s4 + $0x178] sm:$0xff]  ;;  %v1366_v24 = vld [vmem:[%s2472_s5 + $0x208] sm:$0xff] }
  0xaa   :  { %v706_v11 = vsub.f32 %v505_v62, %v58_v33  ;;  %v707_v13 = vsub.f32 %v531_v63, %v59_v18  ;;  %1410 = vmatmul.msk.f32.gmra.mxu2 %vm726_vm1, %v1993_v40  ;;  %1413 = vmatmul.msk.f32.gmra.mxu3 %vm726_vm1, %v1993_v40  ;;  %v204_v17 = vmax.f32 %v178_v4, %v198_v50  ;;  %v1330_v4 = vld [vmem:[%s2472_s5 + $0x178] sm:$0xff] }
  0xab   :  { %1405 = vmatmul.msk.f32.gmra.mxu0 %vm726_vm1, %v2138_v0  ;;  %1408 = vmatmul.msk.f32.gmra.mxu1 %vm726_vm1, %v2138_v0  ;;  %v333_v33 = vmax.f32 %v307_v21, %v327_v54  ;;  %v127_v18 = vmax.f32 %v101_v19, %v121_v31  ;;  %v713_v50 = vmul.f32 %v2124_v42, %v2124_v42  ;;  %v1312_v42 = vld [vmem:[%s2471_s4 + $0x148] sm:$0xff]  ;;  %v1354_v21 = vld [vmem:[%s2472_s5 + $0x1d8] sm:$0xff] }
  0xac   :  { %v724_v26 = vmul.f32 %v706_v11, %v706_v11  ;;  %v725_v59 = vmul.f32 %v707_v13, %v707_v13  ;;  %v230_v34 = vmax.f32 %v204_v17, %v224_v5  ;;  %v364_v54 = vmul.f32 %v358_v32, %v358_v32  ;;  %v1342_v11 = vld [vmem:[%s2472_s5 + $0x1a8] sm:$0xff] }
  0xad   :  { %v359_v46 = vmax.f32 %v333_v33, %v353_v55  ;;  %v153_v52 = vmax.f32 %v127_v18, %v147_v35  ;;  %v225_v62 = vsub.f32 %v1300_v43, %v1306_v49  ;;  %v277_v19 = vsub.f32 %v1324_v3, %v1330_v4 }
  0xae   :  { %853 = vmatpush.msra.mxu0 %v724_v26  ;;  %879 = vmatpush.msra.mxu1 %v725_v59  ;;  %v256_v1 = vmax.f32 %v230_v34, %v250_v57  ;;  %v303_v57 = vsub.f32 %v1336_v9, %v1342_v11  ;;  %v355_v27 = vsub.f32 %v1360_v22, %v1366_v24  ;;  %v60_v11 = vld [vmem:[%s2470_s3] sm:$0xff] }
  0xaf   :  { %v365_v55 = vmul.f32 %v359_v46, %v359_v46  ;;  %v179_v61 = vmax.f32 %v153_v52, %v173_v44 }
  0xb0   :  { %854 = vmatpush.msra.mxu0 %v718_v38  ;;  %880 = vmatpush.msra.mxu1 %v719_v53  ;;  %v282_v56 = vmax.f32 %v256_v1, %v276_v60  ;;  %v1318_v53 = vld [vmem:[%s2472_s5 + $0x148] sm:$0xff] }
  0xb1   :  { %v205_v5 = vmax.f32 %v179_v61, %v199_v30  ;;  %v251_v6 = vsub.f32 %v1312_v42, %v1318_v53  ;;  %v2311_v34 = vpop.f32.mrf.mxu0 }
  0xb2   :  { %1411 = vmatmul.msk.f32.gmra.mxu2 %vm726_vm1, %v2138_v0  ;;  %1414 = vmatmul.msk.f32.gmra.mxu3 %vm726_vm1, %v2138_v0  ;;  %v308_v63 = vmax.f32 %v282_v56, %v302_v48 }
  0xb3   :  { %855 = vmatpush.msra.mxu0 %v712_v45  ;;  %881 = vmatpush.msra.mxu1 %v713_v50  ;;  %v231_v13 = vmax.f32 %v205_v5, %v225_v62 }
  0xb4   :  { %1415 = vmatmul.msk.f32.vlgmr.msra.gmra.mxu0 %vm726_vm1, %v1898_v47  ;;  %1418 = vmatmul.msk.f32.vlgmr.msra.gmra.mxu1 %vm726_vm1, %v1898_v47  ;;  %v334_v10 = vmax.f32 %v308_v63, %v328_v58  ;;  %v1348_v47 = vld [vmem:[%s2471_s4 + $0x1d8] sm:$0xff] }
  0xb5   :  { %959 = vmatpush.msrb.mxu0 %v364_v54  ;;  %985 = vmatpush.msrb.mxu1 %v365_v55  ;;  %v257_v17 = vmax.f32 %v231_v13, %v251_v6  ;;  %v329_v59 = vsub.f32 %v1348_v47, %v1354_v21 }
  0xb6   :  { %v360_v20 = vmax.f32 %v334_v10, %v354_v2 }
  0xb7   :  { %v283_v26 = vmax.f32 %v257_v17, %v277_v19 }
  0xb8   :  { %v366_v16 = vmul.f32 %v360_v20, %v360_v20  ;;  %v61_v20 = vld [vmem:[%s2470_s3 + $0x8] sm:$0xff] }
  0xb9   :  { %v309_v60 = vmax.f32 %v283_v26, %v303_v57  ;;  %v2319_v37 = vpop.f32.mrf.mxu0 }
  0xba   :  { %1421 = vmatmul.msk.f32.vlgmr.msra.gmra.mxu2 %vm368_vm0, %v1563_v8  ;;  %1424 = vmatmul.msk.f32.vlgmr.msra.gmra.mxu3 %vm368_vm0, %v1563_v8 }
  0xbb   :  { %1011 = vmatpush.msrb.mxu2 %v366_v16  ;;  %v335_v28 = vmax.f32 %v309_v60, %v329_v59 }
  0xbc   :  { %1416 = vmatmul.msk.f32.gmra.mxu0 %vm726_vm1, %v1993_v40  ;;  %1419 = vmatmul.msk.f32.gmra.mxu1 %vm726_vm1, %v1993_v40  ;;  %v577_v40 = vpop.f32.mrf.mxu3 }
  0xbd   :  { %v361_v31 = vmax.f32 %v335_v28, %v355_v27  ;;  %v1121_v57 = vsub.f32 %v577_v40, %v61_v20 }
  0xbf   :  { %v367_v32 = vmul.f32 %v361_v31, %v361_v31  ;;  %v1139_v59 = vand.u32 2147483647, %v1121_v57 }
  0xc1   :  { %1037 = vmatpush.msrb.mxu3 %v367_v32  ;;  %v2327_v29 = vpop.f32.mrf.mxu0 }
  0xc2   :  { %1422 = vmatmul.msk.f32.gmra.mxu2 %vm368_vm0, %v1592_v15  ;;  %1425 = vmatmul.msk.f32.gmra.mxu3 %vm368_vm0, %v1592_v15 }
  0xc4   :  { %1417 = vmatmul.msk.f32.gmra.mxu0 %vm726_vm1, %v2138_v0  ;;  %1420 = vmatmul.msk.f32.gmra.mxu1 %vm726_vm1, %v2138_v0  ;;  %v2309_v33 = vpop.f32.mrf.mxu3 }
  0xca   :  { %1423 = vmatmul.msk.f32.gmra.mxu2 %vm368_vm0, %v1611_v23  ;;  %1426 = vmatmul.msk.f32.gmra.mxu3 %vm368_vm0, %v1611_v23 }
  0xcc   :  { %1427 = vmatmul.msk.f32.vlgmr.msrb.gmra.mxu0 %vm368_vm0, %v1563_v8  ;;  %1430 = vmatmul.msk.f32.vlgmr.msrb.gmra.mxu1 %vm368_vm0, %v1563_v8  ;;  %v2317_v36 = vpop.f32.mrf.mxu3 }
  0xd2   :  { %1433 = vmatmul.msk.f32.vlgmr.msrb.gmra.mxu2 %vm368_vm0, %v1563_v8  ;;  %1436 = vmatmul.msk.f32.vlgmr.msrb.gmra.mxu3 %vm368_vm0, %v1563_v8  ;;  %v551_v8 = vpop.f32.mrf.mxu2 }
  0xd3   :  { %v1120_v47 = vsub.f32 %v551_v8, %v60_v11  ;;  %v62_v8 = vld [vmem:[%s2470_s3 + $0x10] sm:$0xff] }
  0xd4   :  { %1428 = vmatmul.msk.f32.gmra.mxu0 %vm368_vm0, %v1592_v15  ;;  %1431 = vmatmul.msk.f32.gmra.mxu1 %vm368_vm0, %v1592_v15 }
  0xd5   :  { %v1138_v16 = vand.u32 2147483647, %v1120_v47 }
  0xda   :  { %1434 = vmatmul.msk.f32.gmra.mxu2 %vm368_vm0, %v1592_v15  ;;  %1437 = vmatmul.msk.f32.gmra.mxu3 %vm368_vm0, %v1592_v15  ;;  %v2307_v0 = vpop.f32.mrf.mxu2  ;;  %v2313_v15 = vpop.f32.mrf.mxu1 }
  0xdc   :  { %1429 = vmatmul.msk.f32.gmra.mxu0 %vm368_vm0, %v1611_v23  ;;  %1432 = vmatmul.msk.f32.gmra.mxu1 %vm368_vm0, %v1611_v23 }
  0xe2   :  { %1435 = vmatmul.msk.f32.gmra.mxu2 %vm368_vm0, %v1611_v23  ;;  %1438 = vmatmul.msk.f32.gmra.mxu3 %vm368_vm0, %v1611_v23  ;;  %v2315_v35 = vpop.f32.mrf.mxu2  ;;  %v2321_v38 = vpop.f32.mrf.mxu1 }
  0xe3   :  { %v2325_v23 = vpop.f32.mrf.mxu3 }
  0xea   :  { %v2323_v39 = vpop.f32.mrf.mxu2  ;;  %v2329_v18 = vpop.f32.mrf.mxu1 }
  0xeb   :  { %v2333_v45 = vpop.f32.mrf.mxu3 }
  0xf2   :  { %v2331_v44 = vpop.f32.mrf.mxu2 }
  0xf3   :  { %v2337_v43 = vpop.f32.mrf.mxu3 }
  0xfa   :  { %v2335_v48 = vpop.f32.mrf.mxu2 }
 0x118   :  { %v753_v46 = vpop.f32.mrf.mxu0  ;;  %v779_v1 = vpop.f32.mrf.mxu1 }
 0x120   :  { %v756_v49 = vpop.f32.mrf.mxu0  ;;  %v2339_v50 = vpop.f32.mrf.mxu1 }
 0x125   :  { %v805_v41 = vpop.f32.mrf.mxu2  ;;  %v831_v51 = vpop.f32.mrf.mxu3 }
 0x128   :  { %v2341_v52 = vpop.f32.mrf.mxu0  ;;  %v2343_v30 = vpop.f32.mrf.mxu1 }
 0x12d   :  { %v2345_v54 = vpop.f32.mrf.mxu2  ;;  %v2347_v55 = vpop.f32.mrf.mxu3 }
 0x131   :  { %v2349_v56 = vpop.f32.mrf.mxu0  ;;  %v2351_v58 = vpop.f32.mrf.mxu1 }
 0x135   :  { %v2353_v42 = vpop.f32.mrf.mxu2  ;;  %v2355_v53 = vpop.f32.mrf.mxu3 }
 0x139   :  { %v2357_v61 = vpop.f32.mrf.mxu0  ;;  %v2359_v62 = vpop.f32.mrf.mxu1 }
 0x13d   :  { %v909_v63 = vpop.f32.mrf.mxu2  ;;  %v935_v2 = vpop.f32.mrf.mxu3 }
 0x13e   :  { %v1048_v3 = vmax.f32 %v753_v46, %v909_v63  ;;  %v1049_v4 = vmax.f32 %v779_v1, %v935_v2 }
 0x140   :  { %v1066_v5 = vmul.f32 -0.5, %v1048_v3  ;;  %v1067_v6 = vmul.f32 -0.5, %v1049_v4 }
 0x141   :  { %v2361_v10 = vpop.f32.mrf.mxu0  ;;  %v2363_v9 = vpop.f32.mrf.mxu1 }
 0x142   :  { %v1084_v13 = vmul.f32 1.442695, %v1066_v5  ;;  %v1086_v19 = vmul.f32 1.442695, %v1067_v6 }
 0x144   :  { %1444 = vpow2.f32 %v1084_v13 }
 0x145   :  { %1446 = vpow2.f32 %v1086_v19  ;;  %v912_v21 = vpop.f32.mrf.mxu2  ;;  %v938_v17 = vpop.f32.mrf.mxu3 }
 0x146   :  { %v1054_v5 = vmax.f32 %v756_v49, %v912_v21  ;;  %v1055_v13 = vmax.f32 %v2339_v50, %v938_v17 }
 0x148   :  { %v1072_v11 = vmul.f32 -0.5, %v1054_v5 }
 0x149   :  { %v961_v22 = vpop.f32.mrf.mxu0  ;;  %v987_v24 = vpop.f32.mrf.mxu1 }
 0x14a   :  { %v1445_v26 = vpop.eup %1444  ;;  %v1050_v60 = vmax.f32 %v805_v41, %v961_v22  ;;  %v1051_v27 = vmax.f32 %v831_v51, %v987_v24  ;;  %v63_v41 = vld [vmem:[%s2470_s3 + $0x18] sm:$0xff]  ;;  %v1122_v51 = vsub.f32 %v2311_v34, %v62_v8  ;;  %v65_v8 = vld [vmem:[%s2470_s3 + $0x28] sm:$0xff] }
 0x14b   :  { %v1447_v28 = vpop.eup %1446  ;;  %v1156_v31 = vmul.f32 %v1445_v26, %v1138_v16  ;;  %v1123_v6 = vsub.f32 %v2313_v15, %v63_v41  ;;  %v66_v41 = vld [vmem:[%s2470_s3 + $0x30] sm:$0xff] }
 0x14c   :  { %v1157_v32 = vmul.f32 %v1447_v28, %v1139_v59  ;;  %v1068_v46 = vmul.f32 -0.5, %v1050_v60  ;;  %v1069_v1 = vmul.f32 -0.5, %v1051_v27  ;;  %v1140_v47 = vand.u32 2147483647, %v1122_v51  ;;  %v67_v51 = vld [vmem:[%s2470_s3 + $0x38] sm:$0xff] }
 0x14d   :  { %v2371_v63 = vpop.f32.mrf.mxu2  ;;  %v2373_v2 = vpop.f32.mrf.mxu3  ;;  %v1141_v34 = vand.u32 2147483647, %v1123_v6  ;;  %v1096_v59 = vmul.f32 1.442695, %v1072_v11  ;;  %v1073_v60 = vmul.f32 -0.5, %v1055_v13 }
 0x14e   :  { %v1174_v40 = vadd.f32 %v1157_v32, %v1156_v31  ;;  %v1088_v3 = vmul.f32 1.442695, %v1068_v46  ;;  %v1090_v4 = vmul.f32 1.442695, %v1069_v1  ;;  %v64_v32 = vld [vmem:[%s2470_s3 + $0x20] sm:$0xff]  ;;  %v1060_v6 = vmax.f32 %v2341_v52, %v2371_v63 }
 0x14f   :  { %v1061_v52 = vmax.f32 %v2343_v30, %v2373_v2 }
 0x150   :  { %1448 = vpow2.f32 %v1088_v3 }
 0x151   :  { %1450 = vpow2.f32 %v1090_v4  ;;  %v964_v19 = vpop.f32.mrf.mxu0  ;;  %v990_v20 = vpop.f32.mrf.mxu1 }
 0x152   :  { %v1056_v49 = vmax.f32 %v2345_v54, %v964_v19  ;;  %v1057_v27 = vmax.f32 %v2347_v55, %v990_v20  ;;  %1452 = vpow2.f32 %v1096_v59  ;;  %v1210_v55 = vmul.f32 %v1558_v7, %v1558_v7 }
 0x153   :  { %v1212_v19 = vmul.f32 %v1587_v14, %v1587_v14  ;;  %v1125_v20 = vsub.f32 %v2325_v23, %v65_v8 }
 0x154   :  { %v1074_v54 = vmul.f32 -0.5, %v1056_v49  ;;  %v1075_v3 = vmul.f32 -0.5, %v1057_v27  ;;  %v1215_v23 = vadd.f32 %v1613_v25, %v1210_v55 }
 0x155   :  { %v1013_v57 = vpop.f32.mrf.mxu2  ;;  %v1039_v16 = vpop.f32.mrf.mxu3  ;;  %v1143_v2 = vand.u32 2147483647, %v1125_v20 }
 0x156   :  { %v1449_v22 = vpop.eup %1448  ;;  %v1052_v21 = vmax.f32 %v2349_v56, %v1013_v57  ;;  %v1053_v24 = vmax.f32 %v2351_v58, %v1039_v16  ;;  %v1098_v58 = vmul.f32 1.442695, %v1073_v60  ;;  %v1100_v11 = vmul.f32 1.442695, %v1074_v54  ;;  %v68_v57 = vld [vmem:[%s2470_s3 + $0x40] sm:$0xff] }
 0x157   :  { %v1451_v26 = vpop.eup %1450  ;;  %v1158_v15 = vmul.f32 %v1449_v22, %v1140_v47  ;;  %v1127_v22 = vsub.f32 %v2309_v33, %v67_v51  ;;  %v1128_v30 = vsub.f32 %v2319_v37, %v68_v57  ;;  %v1079_v33 = vmul.f32 -0.5, %v1061_v52  ;;  %v70_v37 = vld [vmem:[%s2470_s3 + $0x50] sm:$0xff] }
 0x158   :  { %v1070_v50 = vmul.f32 -0.5, %v1052_v21  ;;  %v1071_v17 = vmul.f32 -0.5, %v1053_v24  ;;  %v1159_v31 = vmul.f32 %v1451_v26, %v1141_v34  ;;  %v1453_v16 = vpop.eup %1452  ;;  %v1078_v24 = vmul.f32 -0.5, %v1060_v6 }
 0x159   :  { %v1175_v28 = vadd.f32 %v1174_v40, %v1158_v15  ;;  %v1124_v40 = vsub.f32 %v2323_v39, %v64_v32  ;;  %v1211_v39 = vmul.f32 %v1582_v12, %v1582_v12  ;;  %v967_v47 = vpop.f32.mrf.mxu0  ;;  %v1126_v12 = vsub.f32 %v2307_v0, %v66_v41  ;;  %v993_v49 = vpop.f32.mrf.mxu1  ;;  %v69_v0 = vld [vmem:[%s2470_s3 + $0x48] sm:$0xff] }
 0x15a   :  { %v1092_v46 = vmul.f32 1.442695, %v1070_v50  ;;  %v1094_v56 = vmul.f32 1.442695, %v1071_v17  ;;  %v1062_v26 = vmax.f32 %v2353_v42, %v967_v47  ;;  %v1063_v25 = vmax.f32 %v2355_v53, %v993_v49 }
 0x15b   :  { %v1176_v1 = vadd.f32 %v1175_v28, %v1159_v31  ;;  %v1142_v14 = vand.u32 2147483647, %v1124_v40  ;;  %v1216_v15 = vadd.f32 %v1215_v23, %v1211_v39  ;;  %v1144_v17 = vand.u32 2147483647, %v1126_v12  ;;  %v71_v40 = vld [vmem:[%s2470_s3 + $0x58] sm:$0xff] }
 0x15c   :  { %1454 = vpow2.f32 %v1092_v46  ;;  %v1108_v46 = vmul.f32 1.442695, %v1078_v24  ;;  %v1145_v8 = vand.u32 2147483647, %v1127_v22  ;;  %v1129_v53 = vsub.f32 %v2321_v38, %v69_v0  ;;  %v72_v38 = vld [vmem:[%s2470_s3 + $0x60] sm:$0xff] }
 0x15d   :  { %1456 = vpow2.f32 %v1094_v56  ;;  %v1016_v4 = vpop.f32.mrf.mxu2  ;;  %v1042_v5 = vpop.f32.mrf.mxu3  ;;  %v2426_v54 = vadd.f32 %v1216_v15, %v1212_v19  ;;  %v1080_v56 = vmul.f32 -0.5, %v1062_v26  ;;  %v1146_v51 = vand.u32 2147483647, %v1128_v30 }
 0x15e   :  { %v1058_v13 = vmax.f32 %v2357_v61, %v1016_v4  ;;  %v1059_v7 = vmax.f32 %v2359_v62, %v1042_v5  ;;  %1458 = vpow2.f32 %v1098_v58  ;;  %v1102_v61 = vmul.f32 1.442695, %v1075_v3 }
 0x15f   :  { %1460 = vpow2.f32 %v1100_v11  ;;  %v1162_v3 = vmul.f32 %v1453_v16, %v1144_v17  ;;  %v1110_v4 = vmul.f32 1.442695, %v1079_v33  ;;  %v1081_v5 = vmul.f32 -0.5, %v1063_v25  ;;  %v77_v17 = vld [vmem:[%s2470_s3 + $0x88] sm:$0xff] }
 0x160   :  { %v1076_v63 = vmul.f32 -0.5, %v1058_v13  ;;  %v1077_v62 = vmul.f32 -0.5, %v1059_v7  ;;  %1462 = vpow2.f32 %v1102_v61  ;;  %v1130_v6 = vsub.f32 %v2331_v44, %v70_v37  ;;  %v73_v44 = vld [vmem:[%s2470_s3 + $0x68] sm:$0xff] }
 0x161   :  { %v1112_v7 = vmul.f32 1.442695, %v1080_v56  ;;  %v1147_v19 = vand.u32 2147483647, %v1129_v53  ;;  %v1131_v20 = vsub.f32 %v2333_v45, %v71_v40  ;;  %v74_v45 = vld [vmem:[%s2470_s3 + $0x70] sm:$0xff]  ;;  %v1133_v49 = vsub.f32 %v2317_v36, %v73_v44  ;;  %v76_v36 = vld [vmem:[%s2470_s3 + $0x80] sm:$0xff] }
 0x162   :  { %v1455_v21 = vpop.eup %1454  ;;  %v1104_v34 = vmul.f32 1.442695, %v1076_v63  ;;  %v1106_v27 = vmul.f32 1.442695, %v1077_v62  ;;  %v1132_v63 = vsub.f32 %v2315_v35, %v72_v38  ;;  %v1148_v62 = vand.u32 2147483647, %v1130_v6 }
 0x163   :  { %v1457_v59 = vpop.eup %1456  ;;  %v1160_v60 = vmul.f32 %v1455_v21, %v1142_v14  ;;  %v1149_v23 = vand.u32 2147483647, %v1131_v20  ;;  %v75_v35 = vld [vmem:[%s2470_s3 + $0x78] sm:$0xff]  ;;  %v1134_v30 = vsub.f32 %v2327_v29, %v74_v45  ;;  %v1151_v0 = vand.u32 2147483647, %v1133_v49 }
 0x164   :  { %v1459_v50 = vpop.eup %1458  ;;  %v1161_v42 = vmul.f32 %v1457_v59, %v1143_v2  ;;  %1464 = vpow2.f32 %v1104_v34  ;;  %v1150_v59 = vand.u32 2147483647, %v1132_v63  ;;  %v1135_v33 = vsub.f32 %v2329_v18, %v75_v35 }
 0x165   :  { %v1177_v28 = vadd.f32 %v1176_v1, %v1160_v60  ;;  %v1019_v31 = vpop.f32.mrf.mxu2  ;;  %v1045_v32 = vpop.f32.mrf.mxu3  ;;  %1466 = vpow2.f32 %v1106_v27  ;;  %v1163_v11 = vmul.f32 %v1459_v50, %v1145_v8  ;;  %v1152_v29 = vand.u32 2147483647, %v1134_v30 }
 0x166   :  { %v1064_v58 = vmax.f32 %v2361_v10, %v1019_v31  ;;  %v1461_v1 = vpop.eup %1460  ;;  %v1065_v41 = vmax.f32 %v2363_v9, %v1045_v32  ;;  %1468 = vpow2.f32 %v1108_v46  ;;  %v1114_v9 = vmul.f32 1.442695, %v1081_v5 }
 0x167   :  { %v1178_v55 = vadd.f32 %v1177_v28, %v1161_v42  ;;  %v1463_v13 = vpop.eup %1462  ;;  %v1164_v47 = vmul.f32 %v1461_v1, %v1146_v51  ;;  %1470 = vpow2.f32 %v1110_v4  ;;  %v1136_v28 = vsub.f32 %v2335_v48, %v76_v36 }
 0x168   :  { %v1082_v39 = vmul.f32 -0.5, %v1064_v58  ;;  %v1083_v61 = vmul.f32 -0.5, %v1065_v41  ;;  %v1165_v16 = vmul.f32 %v1463_v13, %v1147_v19  ;;  %1472 = vpow2.f32 %v1112_v7 }
 0x169   :  { %v1179_v10 = vadd.f32 %v1178_v55, %v1162_v3  ;;  %1474 = vpow2.f32 %v1114_v9  ;;  %v1153_v37 = vand.u32 2147483647, %v1135_v33  ;;  %v1137_v46 = vsub.f32 %v2337_v43, %v77_v17 }
 0x16a   :  { %v1465_v52 = vpop.eup %1464  ;;  %v1116_v14 = vmul.f32 1.442695, %v1082_v39  ;;  %v1118_v34 = vmul.f32 1.442695, %v1083_v61  ;;  %v1154_v8 = vand.u32 2147483647, %v1136_v28 }
 0x16b   :  { %v1180_v57 = vadd.f32 %v1179_v10, %v1163_v11  ;;  %v1467_v22 = vpop.eup %1466  ;;  %v1166_v21 = vmul.f32 %v1465_v52, %v1148_v62  ;;  %v1155_v1 = vand.u32 2147483647, %v1137_v46 }
 0x16c   :  { %v1469_v26 = vpop.eup %1468  ;;  %v1167_v60 = vmul.f32 %v1467_v22, %v1149_v23  ;;  %1476 = vpow2.f32 %v1116_v14 }
 0x16d   :  { %v1181_v12 = vadd.f32 %v1180_v57, %v1164_v47  ;;  %v1471_v15 = vpop.eup %1470  ;;  %v1168_v25 = vmul.f32 %v1469_v26, %v1150_v59  ;;  %1478 = vpow2.f32 %v1118_v34 }
 0x16e   :  { %v1473_v50 = vpop.eup %1472  ;;  %v1169_v42 = vmul.f32 %v1471_v15, %v1151_v0 }
 0x16f   :  { %v1182_v24 = vadd.f32 %v1181_v12, %v1165_v16  ;;  %v1475_v32 = vpop.eup %1474  ;;  %v1170_v56 = vmul.f32 %v1473_v50, %v1152_v29 }
 0x170   :  { %v1171_v53 = vmul.f32 %v1475_v32, %v1153_v37 }
 0x171   :  { %v1183_v2 = vadd.f32 %v1182_v24, %v1166_v21 }
 0x172   :  { %v1477_v18 = vpop.eup %1476 }
 0x173   :  { %v1184_v27 = vadd.f32 %v1183_v2, %v1167_v60  ;;  %v1479_v55 = vpop.eup %1478  ;;  %v1172_v40 = vmul.f32 %v1477_v18, %v1154_v8 }
 0x174   :  { %v1173_v5 = vmul.f32 %v1479_v55, %v1155_v1 }
 0x175   :  { %v1185_v31 = vadd.f32 %v1184_v27, %v1168_v25 }
 0x177   :  { %v1186_v58 = vadd.f32 %v1185_v31, %v1169_v42 }
 0x179   :  { %v1187_v3 = vadd.f32 %v1186_v58, %v1170_v56 }
 0x17b   :  { %v1188_v4 = vadd.f32 %v1187_v3, %v1171_v53 }
 0x17d   :  { %v1189_v41 = vadd.f32 %v1188_v4, %v1172_v40 }
 0x17f   :  { %v1190_v51 = vadd.f32 %v1189_v41, %v1173_v5 }
 0x181   :  { %1191 = vadd.xlane.f32.xlu0 %v1190_v51 }
 0x189   :  { %1218 = vadd.xlane.f32.xlu0 %v2426_v54 }
 0x1f4   :  { %v1192_v48 = vpop.xlane.xlu0 %1191 }
 0x1f5   :  { %v1193_v6 = vrot.slane %v1192_v48, 4 }
 0x1f7   :  { %v1194_v11 = vadd.f32 %v1193_v6, %v1192_v48 }
 0x1f9   :  { %v1195_v43 = vrot.slane %v1194_v11, 2 }
 0x1fb   :  { %v1196_v10 = vadd.f32 %v1195_v43, %v1194_v11 }
 0x1fc   :  { %v1219_v13 = vpop.xlane.xlu0 %1218 }
 0x1fd   :  { %v1220_v38 = vrot.slane %v1219_v13, 4  ;;  %v1197_v7 = vrot.slane %v1196_v10, 1 }
 0x1ff   :  { %v1221_v39 = vadd.f32 %v1220_v38, %v1219_v13  ;;  %v1198_v19 = vadd.f32 %v1197_v7, %v1196_v10 }
 0x201   :  { %v1222_v20 = vrot.slane %v1221_v39, 2  ;;  %1439 = vpush %v1198_v19 }
 0x203   :  { %v1223_v47 = vadd.f32 %v1222_v20, %v1221_v39 }
 0x205   :  { %v1224_v57 = vrot.slane %v1223_v47, 1 }
 0x207   :  { %v1225_v52 = vadd.f32 %v1224_v57, %v1223_v47 }
 0x209   :  { %1441 = vpush %v1225_v52 }
 0x232   :  { %s1440_s3 = spop %1439 }
 0x233   :  { %s1200_s17 = smul.f32 0.5, %s1440_s3 }
 0x23a   :  { %s1442_s15 = spop %1441 }
 0x23b   :  { %s1227_s16 = smul.f32 0.1, %s1442_s15 }
 0x23d   :  { %s1228_s21 = smul.f32 0.5, %s1227_s16 }
 0x23f   :  { %s1229_s22 = sadd.f32 %s1228_s21, %s1200_s17 }
 0x241   :  { %1231 = sst [smem:[#allocation2]] %s1229_s22 }
 0x242   :  { %1240 = dma.smem_to_hbm %s1494_s23, 16, %s1238_s20, [#allocation3]  }
 0x243   :  { %1492 = dma.done.wait [#allocation3], 16  }
 0x244   :  { %1493 = vsyncadd [#allocation3], 4294967280 }
 0x245   :  { %1245 = sfence }
 0x246   :  { %1246 = vsyncpa [#allocation3], 1 }

</bundles_post_ra>
